<compile_context>
chip_gen: v7x
topology: tpu7x:2x2x1
jax: 0.10.0
libtpu: 0.0.40
codegen_flags: <defaults>
</compile_context>

<pallas_src>
import functools

import jax
import jax.numpy as jnp
from jax.experimental import pallas as pl
from jax.experimental.pallas import tpu as pltpu

_LANE = 128


def _round_up(a, b):
    return ((a + b - 1) // b) * b


def _outconv_kernel(w_ref, b_ref, x_ref, o_ref):
    # w_ref: SMEM (C_out, C_in) f32      b_ref: SMEM (C_out,) f32
    # x_ref: VMEM (C_in, t_hw)           o_ref: VMEM (C_out, t_hw)
    c_out, c_in = w_ref.shape
    x = x_ref[...].astype(jnp.float32)            # lane-dense pixel rows
    rows = []
    for o in range(c_out):                        # tiny static loops -> VPU FMAs
        acc = x[0:1, :] * w_ref[o, 0]
        for c in range(1, c_in):
            acc = acc + x[c:c + 1, :] * w_ref[o, c]
        rows.append(acc + b_ref[o])
    # One store for the whole output tile (avoids per-row masked sublane stores).
    o_ref[...] = jnp.concatenate(rows, axis=0).astype(o_ref.dtype)


@functools.partial(jax.jit, static_argnames=("max_tile_pixels",))
def outconv_forward(x_nchw, weight, bias, *, max_tile_pixels=8192):
    """1x1 conv forward.

    x_nchw : (N, C_in, H, W)
    weight : (C_out, C_in) or (C_out, C_in, 1, 1)   (Conv2d weight)
    bias   : (C_out,)
    returns: (N, C_out, H, W)
    """
    N, C_in, H, W = x_nchw.shape
    if weight.ndim == 4:  # torch Conv2d layout (C_out, C_in, 1, 1)
        weight = weight.reshape(weight.shape[0], weight.shape[1])
    C_out = weight.shape[0]
    HW = H * W

    # Lane-dense pixel tile: a multiple of 128, as fat as the cap allows.
    t_hw = min(_round_up(HW, _LANE), _round_up(max_tile_pixels, _LANE))
    hw_pad = _round_up(HW, t_hw)

    x3 = x_nchw.reshape(N, C_in, HW)              # free reshape, no transpose
    if hw_pad != HW:
        x3 = jnp.pad(x3, ((0, 0), (0, 0), (0, hw_pad - HW)))

    w_f32 = weight.astype(jnp.float32)
    b_f32 = bias.astype(jnp.float32)

    out = pl.pallas_call(
        _outconv_kernel,
        out_shape=jax.ShapeDtypeStruct((N, C_out, hw_pad), x_nchw.dtype),
        grid_spec=pltpu.PrefetchScalarGridSpec(
            num_scalar_prefetch=2,                # weight, bias -> SMEM (resident)
            grid=(N, hw_pad // t_hw),
            in_specs=[
                pl.BlockSpec((None, C_in, t_hw), lambda n, j, w, b: (n, 0, j)),
            ],
            out_specs=pl.BlockSpec((None, C_out, t_hw), lambda n, j, w, b: (n, 0, j)),
        ),
        compiler_params=pltpu.CompilerParams(
            dimension_semantics=("parallel", "parallel")),
    )(w_f32, b_f32, x3)

    return out[:, :, :HW].reshape(N, C_out, H, W)


if __name__ == "__main__":
    # Small shapes consistent with the module: N=2, in_ch=4, out_ch=3, H=W=16
    N, C_in, C_out, H, W = 2, 4, 3, 16, 16

    key = jax.random.PRNGKey(0)
    kx, kw, kb = jax.random.split(key, 3)

    x = jax.random.normal(kx, (N, C_in, H, W), dtype=jnp.float32)
    # Deterministic synthetic parameters (Conv2d weight (C_out, C_in, 1, 1) squeezed).
    weight = jax.random.normal(kw, (C_out, C_in), dtype=jnp.float32) * 0.1
    bias = jax.random.normal(kb, (C_out,), dtype=jnp.float32) * 0.1

    y = outconv_forward(x, weight, bias)
    y = jax.block_until_ready(y)

    # Pure-JAX reference: 1x1 conv == einsum over channel axis + bias
    y_ref = jnp.einsum("nchw,oc->nohw", x, weight) + bias[None, :, None, None]

    assert y.shape == (N, C_out, H, W)
    assert jnp.allclose(y, y_ref, atol=1e-5, rtol=1e-5)
    print("KERNEL_OK")
</pallas_src>

<mosaic_0001>
module attributes {stable_mosaic.version = 11 : i64} {
  func.func @_outconv_kernel(%arg0: i32, %arg1: i32, %arg2: memref<3x4xf32, #tpu.memory_space<smem>>, %arg3: memref<3xf32, #tpu.memory_space<smem>>, %arg4: memref<1x4x256xf32, #tpu.memory_space<vmem>>, %arg5: memref<1x3x256xf32, #tpu.memory_space<vmem>>) attributes {dimension_semantics = [#tpu.dimension_semantics<parallel>, #tpu.dimension_semantics<parallel>], iteration_bounds = array<i64: 2, 1>, scalar_prefetch = 2 : i64, scratch_operands = 0 : i64, tpu.core_type = #tpu.core_type<tc>, window_params = [{transform_indices = @transform_0, window_bounds = array<i64: 1, 4, 256>}, {transform_indices = @transform_1, window_bounds = array<i64: 1, 3, 256>}]} {
    %c0 = arith.constant 0 : index
    %c0_0 = arith.constant 0 : index
    %c0_1 = arith.constant 0 : index
    %0 = vector.load %arg4[%c0, %c0_0, %c0_1] : memref<1x4x256xf32, #tpu.memory_space<vmem>>, vector<1x4x256xf32>
    %1 = vector.shape_cast %0 : vector<1x4x256xf32> to vector<4x256xf32>
    %2 = vector.extract_strided_slice %1 {offsets = [0, 0], sizes = [1, 256], strides = [1, 1]} : vector<4x256xf32> to vector<1x256xf32>
    %c0_2 = arith.constant 0 : index
    %c0_3 = arith.constant 0 : index
    %3 = memref.load %arg2[%c0_2, %c0_3] : memref<3x4xf32, #tpu.memory_space<smem>>
    %4 = vector.broadcast %3 : f32 to vector<1x256xf32>
    %5 = arith.mulf %2, %4 : vector<1x256xf32>
    %6 = vector.extract_strided_slice %1 {offsets = [1, 0], sizes = [1, 256], strides = [1, 1]} : vector<4x256xf32> to vector<1x256xf32>
    %c0_4 = arith.constant 0 : index
    %c1 = arith.constant 1 : index
    %7 = memref.load %arg2[%c0_4, %c1] : memref<3x4xf32, #tpu.memory_space<smem>>
    %8 = vector.broadcast %7 : f32 to vector<1x256xf32>
    %9 = arith.mulf %6, %8 : vector<1x256xf32>
    %10 = arith.addf %5, %9 : vector<1x256xf32>
    %11 = vector.extract_strided_slice %1 {offsets = [2, 0], sizes = [1, 256], strides = [1, 1]} : vector<4x256xf32> to vector<1x256xf32>
    %c0_5 = arith.constant 0 : index
    %c2 = arith.constant 2 : index
    %12 = memref.load %arg2[%c0_5, %c2] : memref<3x4xf32, #tpu.memory_space<smem>>
    %13 = vector.broadcast %12 : f32 to vector<1x256xf32>
    %14 = arith.mulf %11, %13 : vector<1x256xf32>
    %15 = arith.addf %10, %14 : vector<1x256xf32>
    %16 = vector.extract_strided_slice %1 {offsets = [3, 0], sizes = [1, 256], strides = [1, 1]} : vector<4x256xf32> to vector<1x256xf32>
    %c0_6 = arith.constant 0 : index
    %c3 = arith.constant 3 : index
    %17 = memref.load %arg2[%c0_6, %c3] : memref<3x4xf32, #tpu.memory_space<smem>>
    %18 = vector.broadcast %17 : f32 to vector<1x256xf32>
    %19 = arith.mulf %16, %18 : vector<1x256xf32>
    %20 = arith.addf %15, %19 : vector<1x256xf32>
    %c0_7 = arith.constant 0 : index
    %21 = memref.load %arg3[%c0_7] : memref<3xf32, #tpu.memory_space<smem>>
    %22 = vector.broadcast %21 : f32 to vector<1x256xf32>
    %23 = arith.addf %20, %22 : vector<1x256xf32>
    %24 = vector.extract_strided_slice %1 {offsets = [0, 0], sizes = [1, 256], strides = [1, 1]} : vector<4x256xf32> to vector<1x256xf32>
    %c1_8 = arith.constant 1 : index
    %c0_9 = arith.constant 0 : index
    %25 = memref.load %arg2[%c1_8, %c0_9] : memref<3x4xf32, #tpu.memory_space<smem>>
    %26 = vector.broadcast %25 : f32 to vector<1x256xf32>
    %27 = arith.mulf %24, %26 : vector<1x256xf32>
    %28 = vector.extract_strided_slice %1 {offsets = [1, 0], sizes = [1, 256], strides = [1, 1]} : vector<4x256xf32> to vector<1x256xf32>
    %c1_10 = arith.constant 1 : index
    %c1_11 = arith.constant 1 : index
    %29 = memref.load %arg2[%c1_10, %c1_11] : memref<3x4xf32, #tpu.memory_space<smem>>
    %30 = vector.broadcast %29 : f32 to vector<1x256xf32>
    %31 = arith.mulf %28, %30 : vector<1x256xf32>
    %32 = arith.addf %27, %31 : vector<1x256xf32>
    %33 = vector.extract_strided_slice %1 {offsets = [2, 0], sizes = [1, 256], strides = [1, 1]} : vector<4x256xf32> to vector<1x256xf32>
    %c1_12 = arith.constant 1 : index
    %c2_13 = arith.constant 2 : index
    %34 = memref.load %arg2[%c1_12, %c2_13] : memref<3x4xf32, #tpu.memory_space<smem>>
    %35 = vector.broadcast %34 : f32 to vector<1x256xf32>
    %36 = arith.mulf %33, %35 : vector<1x256xf32>
    %37 = arith.addf %32, %36 : vector<1x256xf32>
    %38 = vector.extract_strided_slice %1 {offsets = [3, 0], sizes = [1, 256], strides = [1, 1]} : vector<4x256xf32> to vector<1x256xf32>
    %c1_14 = arith.constant 1 : index
    %c3_15 = arith.constant 3 : index
    %39 = memref.load %arg2[%c1_14, %c3_15] : memref<3x4xf32, #tpu.memory_space<smem>>
    %40 = vector.broadcast %39 : f32 to vector<1x256xf32>
    %41 = arith.mulf %38, %40 : vector<1x256xf32>
    %42 = arith.addf %37, %41 : vector<1x256xf32>
    %c1_16 = arith.constant 1 : index
    %43 = memref.load %arg3[%c1_16] : memref<3xf32, #tpu.memory_space<smem>>
    %44 = vector.broadcast %43 : f32 to vector<1x256xf32>
    %45 = arith.addf %42, %44 : vector<1x256xf32>
    %46 = vector.extract_strided_slice %1 {offsets = [0, 0], sizes = [1, 256], strides = [1, 1]} : vector<4x256xf32> to vector<1x256xf32>
    %c2_17 = arith.constant 2 : index
    %c0_18 = arith.constant 0 : index
    %47 = memref.load %arg2[%c2_17, %c0_18] : memref<3x4xf32, #tpu.memory_space<smem>>
    %48 = vector.broadcast %47 : f32 to vector<1x256xf32>
    %49 = arith.mulf %46, %48 : vector<1x256xf32>
    %50 = vector.extract_strided_slice %1 {offsets = [1, 0], sizes = [1, 256], strides = [1, 1]} : vector<4x256xf32> to vector<1x256xf32>
    %c2_19 = arith.constant 2 : index
    %c1_20 = arith.constant 1 : index
    %51 = memref.load %arg2[%c2_19, %c1_20] : memref<3x4xf32, #tpu.memory_space<smem>>
    %52 = vector.broadcast %51 : f32 to vector<1x256xf32>
    %53 = arith.mulf %50, %52 : vector<1x256xf32>
    %54 = arith.addf %49, %53 : vector<1x256xf32>
    %55 = vector.extract_strided_slice %1 {offsets = [2, 0], sizes = [1, 256], strides = [1, 1]} : vector<4x256xf32> to vector<1x256xf32>
    %c2_21 = arith.constant 2 : index
    %c2_22 = arith.constant 2 : index
    %56 = memref.load %arg2[%c2_21, %c2_22] : memref<3x4xf32, #tpu.memory_space<smem>>
    %57 = vector.broadcast %56 : f32 to vector<1x256xf32>
    %58 = arith.mulf %55, %57 : vector<1x256xf32>
    %59 = arith.addf %54, %58 : vector<1x256xf32>
    %60 = vector.extract_strided_slice %1 {offsets = [3, 0], sizes = [1, 256], strides = [1, 1]} : vector<4x256xf32> to vector<1x256xf32>
    %c2_23 = arith.constant 2 : index
    %c3_24 = arith.constant 3 : index
    %61 = memref.load %arg2[%c2_23, %c3_24] : memref<3x4xf32, #tpu.memory_space<smem>>
    %62 = vector.broadcast %61 : f32 to vector<1x256xf32>
    %63 = arith.mulf %60, %62 : vector<1x256xf32>
    %64 = arith.addf %59, %63 : vector<1x256xf32>
    %c2_25 = arith.constant 2 : index
    %65 = memref.load %arg3[%c2_25] : memref<3xf32, #tpu.memory_space<smem>>
    %66 = vector.broadcast %65 : f32 to vector<1x256xf32>
    %67 = arith.addf %64, %66 : vector<1x256xf32>
    %68 = tpu.concatenate %23, %45, %67 in 0 : vector<1x256xf32>, vector<1x256xf32>, vector<1x256xf32> -> vector<3x256xf32>
    %c0_26 = arith.constant 0 : index
    %c0_27 = arith.constant 0 : index
    %c0_28 = arith.constant 0 : index
    %69 = vector.load %arg5[%c0_26, %c0_27, %c0_28] : memref<1x3x256xf32, #tpu.memory_space<vmem>>, vector<1x3x256xf32>
    %70 = vector.shape_cast %69 : vector<1x3x256xf32> to vector<3x256xf32>
    %71 = vector.shape_cast %68 : vector<3x256xf32> to vector<1x3x256xf32>
    tpu.vector_store %arg5[%c0_26, %c0_27, %c0_28], %71 {strides = array<i32>} : memref<1x3x256xf32, #tpu.memory_space<vmem>>, vector<1x3x256xf32>,
    return
  }
  func.func @transform_0(%arg0: i32, %arg1: i32, %arg2: memref<3x4xf32, #tpu.memory_space<smem>>, %arg3: memref<3xf32, #tpu.memory_space<smem>>) -> (i32, i32, i32) {
    %c0_i32 = arith.constant 0 : i32
    %c0_i32_0 = arith.constant 0 : i32
    return %arg0, %c0_i32, %arg1 : i32, i32, i32
  }
  func.func @transform_1(%arg0: i32, %arg1: i32, %arg2: memref<3x4xf32, #tpu.memory_space<smem>>, %arg3: memref<3xf32, #tpu.memory_space<smem>>) -> (i32, i32, i32) {
    %c0_i32 = arith.constant 0 : i32
    %c0_i32_0 = arith.constant 0 : i32
    return %arg0, %c0_i32, %arg1 : i32, i32, i32
  }
}

</mosaic_0001>

<bundles_post_ra>
// kernel: outconv_forward.1
= control target key start
LH: loop header
LB: loop body
LE: loop exit
PB: predicated region body
PF: predicated region fallthrough
CT: control target
= control target key end

     0   :  { %s581_s0 = inlined_call_operand.vmem [shape: f32[3,4], index: 0, kind: input, shape index: {}]   ;;  %s582_s2 = inlined_call_operand.vmem [shape: f32[2,4,256], index: 2, kind: input, shape index: {}]   ;;  %s583_s3 = inlined_call_operand.vmem [shape: f32[2,3,256], index: 3, kind: output, shape index: {}]   ;;  %s584_s1 = inlined_call_operand.vmem [shape: f32[3], index: 1, kind: input, shape index: {}]  }
   0x1   :  { %s8_s14 = sshll.u32 %s581_s0, 4  ;;  %s12_s17 = sshll.u32 %s584_s1, 4  ;;  %s9_s14 = int_to_ptr.vmem [resolvable:$true] %s8_s14  ;;  %s13_s17 = int_to_ptr.vmem [resolvable:$true] %s12_s17 }
   0x2   :  { %s451_s18 = scalar_lea.vmem %s9_s14, 64  ;;  %p456_p1 = scmp.lt.s32.totalorder %s9_s14, %s9_s14 }
   0x3   :  { %p452_p0 = scmp.ne.s32.totalorder %s9_s14, %s451_s18  ;;  %p457_p2 = scmp.lt.s32.totalorder %s451_s18, %s451_s18 }
   0x5   :  { %p458_p3 = por %p457_p2, %p456_p1 }
   0x7   :  { %p459_p4 = pnand %p458_p3, %p452_p0 }
   0x9   :  { %462 = shalt.err (!%p459_p4)  }
   0xa   :  { %s501_s19 = smov [#allocation3]   ;;  %s463_s20 = scalar_lea.vmem %s13_s17, 16 }
   0xb   :  { %11 = dma.vmem_to_smem %s9_s14, 64, %s501_s19, [#allocation2] }
   0xc   :  { %p464_p5 = scmp.ne.s32.totalorder %s13_s17, %s463_s20  ;;  %p468_p6 = scmp.lt.s32.totalorder %s13_s17, %s13_s17 }
   0xd   :  { %p469_p7 = scmp.lt.s32.totalorder %s463_s20, %s463_s20 }
   0xf   :  { %p470_p8 = por %p469_p7, %p468_p6 }
  0x11   :  { %p471_p9 = pnand %p470_p8, %p464_p5 }
  0x13   :  { %474 = shalt.err (!%p471_p9)  }
  0x14   :  { %s502_s0 = smov [#allocation4]  }
  0x15   :  { %15 = dma.vmem_to_smem %s13_s17, 16, %s502_s0, [#allocation2] }
  0x16   :  { %487 = dma.done.wait [#allocation2], 80 }
  0x17   :  { %488 = vsyncadd [#allocation2], 4294967216 }
  0x18   :  { %17 = sfence }
  0x19   :  { %s529_s1 = smov 0   ;;  %s531_s21 = smov 0  }
  0x1a   :  { %s533_s22 = smov 0  }
  0x1b LB: > { %s35_s23 = sadd.s32 1, %s495_s21  ;;  %p394_p10 = scmp.ge.s32.totalorder %s499_s22, 1  ;;  %s499_s22 = sphi %s533_s22, %s23_s22   ;;  %s495_s21 = sphi %s531_s21, %s586_s21   ;;  %s491_s1 = sphi %s529_s1, %s585_s1  }
  0x1c   : > { %p37_p11 = scmp.ge.s32.totalorder %s35_s23, 2  ;;  %p120_p12 = scmp.lt.s32.totalorder %s499_s22, 3 }
  0x1e   : > { %s588_s23 = smov (%p37_p11, %s35_s23), 0  ;;  %p121_p13 = pnand %p394_p10, %p120_p12 }
  0x1f   : > { %p149_p0 = scmp.lt.s32.totalorder (!%p121_p13), %s491_s1, 1  ;;  %s169_s24 = sld [smem:[#allocation3]] (!%p121_p13)  ;;  %v260_v4 = vlaneseq (!%p121_p13)  ;;  %vm292_vm0 = vcmask (!%p121_p13), 1040384   ;;  %vm295_vm1 = vcmask (!%p121_p13), 1041408  }
  0x20   : > { %124 = sbr.rel (%p121_p13) target bundleno = 64 (0x40), region = 24  ;;  %s399_s25 = sld [smem:[#allocation3 + $0x1]] (!%p121_p13) }
  0x21   : > { %s401_s26 = sld [smem:[#allocation3 + $0x2]] (!%p121_p13)  ;;  %s403_s27 = sld [smem:[#allocation3 + $0x3]] (!%p121_p13)  ;;  %v261_v14 = vshrl.u32 (!%p121_p13), %v260_v4, 7 }
  0x22   : > { %s549_s28 = sld [smem:[#allocation4]] (!%p121_p13)  ;;  %s406_s7 = sld [smem:[#allocation3 + $0x81]] (!%p121_p13) }
  0x23   : > { %s405_s30 = sld [smem:[#allocation3 + $0x80]] (!%p121_p13)  ;;  %s408_s8 = sld [smem:[#allocation3 + $0x82]] (!%p121_p13)  ;;  %v262_v40 = vsub.s32 (!%p121_p13), 0, %v261_v14  ;;  %v266_v41 = vsub.s32 (!%p121_p13), 4, %v261_v14 }
  0x24   : > { %s410_s9 = sld [smem:[#allocation3 + $0x83]] (!%p121_p13)  ;;  %s413_s10 = sld [smem:[#allocation3 + $0x100]] (!%p121_p13) }
  0x25   : > { %v170_v1 = vstv (!%p121_p13), %s169_s24  ;;  %s414_s11 = sld [smem:[#allocation3 + $0x101]] (!%p121_p13)  ;;  %s557_s12 = sld [smem:[#allocation3 + $0x102]] (!%p121_p13) }
  0x26   : > { %v173_v2 = vstv (!%p121_p13), %s399_s25  ;;  %s559_s13 = sld [smem:[#allocation3 + $0x103]] (!%p121_p13)  ;;  %s562_s14 = sld [smem:[#allocation4 + $0x1]] (!%p121_p13) }
  0x27   : > { %s590_s1 = smov (!%p149_p0, %s491_s1), 1  ;;  %v181_v3 = vstv %s401_s26  ;;  %v189_v8 = vstv %s403_s27  ;;  %s420_s15 = sld [smem:[#allocation4 + $0x2]] }
  0x28   : > { %s423_s29 = sshll.u32 %s590_s1, 3  ;;  %v197_v13 = vstv %s549_s28  ;;  %v203_v17 = vstv %s406_s7 }
  0x29   : > { %s156_s6 = scalar_lea.vmem %s582_s2, %s423_s29  ;;  %v200_v12 = vstv %s405_s30  ;;  %v211_v18 = vstv %s408_s8  ;;  %s166_s18 = scalar_lea.vmem %s583_s3, %s423_s29 }
  0x2a   : > { %v168_v0 = vld [vmem:[%s156_s6] sm:$0xff]  ;;  %v219_v22 = vstv %s410_s9  ;;  %v230_v25 = vstv %s413_s10 }
  0x2b   : > { %v171_v5 = vmul.f32 %v170_v1, %v168_v0  ;;  %v174_v6 = vmul.f32 %v173_v2, %v168_v0  ;;  %v182_v7 = vmul.f32 %v181_v3, %v168_v0  ;;  %v190_v11 = vmul.f32 %v189_v8, %v168_v0 }
  0x2c   : > { %v201_v19 = vmul.f32 %v200_v12, %v168_v0  ;;  %v204_v20 = vmul.f32 %v203_v17, %v168_v0  ;;  %v212_v21 = vmul.f32 %v211_v18, %v168_v0  ;;  %v220_v24 = vmul.f32 %v219_v22, %v168_v0 }
  0x2d   : > { %v400_v9 = vrot.slane %v174_v6, 9  ;;  %v402_v10 = vrot.slane %v182_v7, 10  ;;  %v404_v16 = vrot.slane %v190_v11, 11  ;;  %v233_v26 = vstv %s414_s11 }
  0x2e   : > { %v407_v27 = vrot.slane %v204_v20, 9  ;;  %v409_v28 = vrot.slane %v212_v21, 10  ;;  %v231_v29 = vmul.f32 %v230_v25, %v168_v0  ;;  %v234_v30 = vmul.f32 %v233_v26, %v168_v0 }
  0x2f   : > { %v179_v15 = vadd.f32 %v400_v9, %v171_v5  ;;  %v411_v32 = vrot.slane %v220_v24, 11  ;;  %v241_v33 = vstv %s557_s12  ;;  %v249_v34 = vstv %s559_s13 }
  0x30   : > { %v209_v35 = vadd.f32 %v407_v27, %v201_v19  ;;  %v415_v36 = vrot.slane %v234_v30, 9  ;;  %v242_v37 = vmul.f32 %v241_v33, %v168_v0  ;;  %v250_v38 = vmul.f32 %v249_v34, %v168_v0 }
  0x31   : > { %v187_v23 = vadd.f32 %v402_v10, %v179_v15  ;;  %v227_v46 = vstv %s562_s14  ;;  %v257_v49 = vstv %s420_s15 }
  0x32   : > { %v217_v42 = vadd.f32 %v409_v28, %v209_v35  ;;  %v239_v43 = vadd.f32 %v415_v36, %v231_v29  ;;  %v417_v44 = vrot.slane %v242_v37, 10  ;;  %v419_v45 = vrot.slane %v250_v38, 11 }
  0x33   : > { %v195_v31 = vadd.f32 %v404_v16, %v187_v23 }
  0x34   : > { %v225_v47 = vadd.f32 %v411_v32, %v217_v42  ;;  %v247_v48 = vadd.f32 %v417_v44, %v239_v43 }
  0x35   : > { %v198_v39 = vadd.f32 %v197_v13, %v195_v31 }
  0x36   : > { %v228_v50 = vadd.f32 %v227_v46, %v225_v47  ;;  %v255_v51 = vadd.f32 %v419_v45, %v247_v48 }
  0x37   : > { %v263_v52 = vrot.slane %v198_v39, %v262_v40  ;;  %v267_v53 = vrot.slane %v198_v39, %v266_v41 }
  0x38   : > { %v258_v54 = vadd.f32 %v257_v49, %v255_v51  ;;  %v274_v55 = vrot.slane %v228_v50, %v262_v40  ;;  %v278_v56 = vrot.slane %v228_v50, %v266_v41 }
  0x3a   : > { %v285_v57 = vrot.slane %v258_v54, %v262_v40  ;;  %v289_v58 = vrot.slane %v258_v54, %v266_v41  ;;  %v293_v59 = vsel %vm292_vm0, %v263_v52, %v274_v55  ;;  %v294_v60 = vsel %vm292_vm0, %v267_v53, %v278_v56 }
  0x3c   : > { %v296_v61 = vsel %vm295_vm1, %v293_v59, %v285_v57  ;;  %v297_v62 = vsel %vm295_vm1, %v294_v60, %v289_v58 }
  0x3d   : > { %v300_v63 = vcombine.low %v296_v61, %v297_v62 }
  0x3f   : > { %302 = vst [vmem:[%s166_s18] sm:$0x77] %v300_v63 }
  0x40 PF: > { %s23_s22 = sadd.s32 1, %s499_s22   ;;  %s585_s1 = smov %s495_s21 }
  0x41   : > { %p20_p1 = scmp.ge.s32.totalorder %s23_s22, 4   ;;  %s586_s21 = smov %s588_s23 }
  0x43   :  { %22 = sbr.rel (!%p20_p1) target bundleno = 27 (0x1b), region = 54 }

</bundles_post_ra>
